<compile_context>
chip_gen: v7x
topology: tpu7x:2x2x1
jax: 0.10.0
libtpu: 0.0.40
codegen_flags: <defaults>
</compile_context>

<pallas_src>
import jax
import jax.numpy as jnp
from jax import lax
from jax.experimental import pallas as pl
from jax.experimental.pallas import tpu as pltpu


def _round_up(v, m):
    return ((v + m - 1) // m) * m


def _mish(x):
    # mish(x) = x * tanh(softplus(x)) = x * s / (s + 2),  s = e^x (e^x + 2)
    # Clamp at 20: tanh(softplus(20)) == 1.0 exactly in f32, and the clamp
    # keeps s finite (no inf/nan intermediates).
    xc = jnp.minimum(x, 20.0)
    e = jnp.exp(xc)                       # EUP transcendental (free slot)
    s = e * (e + 2.0)
    d = s + 2.0
    inv = pl.reciprocal(d, approx=True)   # EUP vrcp (free slot)
    inv = inv * (2.0 - d * inv)           # one Newton step -> ~f32 accuracy
    return x * s * inv


def _net_kernel(x_ref,
                w1_ref, b1_ref,
                w2_ref, b2_ref,
                w3_ref, b3_ref,
                w4_ref, b4_ref,
                o_ref):
    x = x_ref[...]                                            # (TB, F) batch tile

    # Layer 1: h1^T = W1^T @ x^T via an A @ B^T (NT) contraction.  The MXU
    # handles the transposed streamed operand (flash-attention q@k^T pattern),
    # so no explicit transpose of the big x tile is needed.  Result is
    # feature-major: (n_hidden, TB) with batch on the dense lane axis.
    h = lax.dot_general(w1_ref[...], x, (((1,), (1,)), ((), ())),
                        preferred_element_type=jnp.float32)   # (H, TB)
    h = _mish(h + b1_ref[...])

    h = _mish(jnp.dot(w2_ref[...], h, preferred_element_type=jnp.float32)
              + b2_ref[...])                                  # (H, TB)
    h = _mish(jnp.dot(w3_ref[...], h, preferred_element_type=jnp.float32)
              + b3_ref[...])                                  # (O, TB)
    y = jnp.dot(w4_ref[...], h, preferred_element_type=jnp.float32) + b4_ref[...]

    o_ref[...] = y.astype(o_ref.dtype)                        # (O, TB) lane-dense store


def net_mish_ranger_forward(x, params, *, batch_tile=8192):
    """x: (B, n_feature) f32.  params: dict of weights/biases (see init_params)."""
    B, n_feature = x.shape
    n_hidden = params["w1"].shape[1]
    n_output = params["w4"].shape[1]

    # Feature-major (transposed) weights / biases — tiny one-time copies.
    w1t, w2t = params["w1"].T, params["w2"].T       # (H,F), (H,H)
    w3t, w4t = params["w3"].T, params["w4"].T       # (O,H), (O,O)
    b1t, b2t = params["b1"].T, params["b2"].T       # (H,1), (H,1)
    b3t, b4t = params["b3"].T, params["b4"].T       # (O,1), (O,1)

    # ---- batch tile selection -------------------------------------------
    # Multiple of 8 (sublane rule); prefer multiples of 128 (lane-dense
    # stores) when the batch is large; cap so the grid has >= 2 steps when
    # B allows (keeps both v7x TensorCores busy with "parallel" semantics).
    batch_tile = max(8, (batch_tile // 8) * 8)
    B8 = _round_up(B, 8)
    if B8 <= 8:
        TB = 8
    else:
        half = (B8 + 1) // 2
        unit = 128 if half >= 128 else 8
        TB = min(batch_tile, _round_up(half, unit))
    B_pad = _round_up(B, TB)

    # Only pad the ragged remainder rows (zero rows are exact: they are never
    # returned and per-column independence keeps valid columns clean).
    x_in = x if B_pad == B else jnp.pad(x, ((0, B_pad - B), (0, 0)))
    grid = (B_pad // TB,)

    def const_spec(a):
        # Whole array, same block every grid step -> stays VMEM-resident.
        return pl.BlockSpec(a.shape, lambda i: (0,) * a.ndim)

    out_t = pl.pallas_call(
        _net_kernel,
        out_shape=jax.ShapeDtypeStruct((n_output, B_pad), jnp.float32),
        grid=grid,
        in_specs=[
            pl.BlockSpec((TB, n_feature), lambda i: (i, 0)),   # x: tiled over batch
            const_spec(w1t), const_spec(b1t),
            const_spec(w2t), const_spec(b2t),
            const_spec(w3t), const_spec(b3t),
            const_spec(w4t), const_spec(b4t),
        ],
        out_specs=pl.BlockSpec((n_output, TB), lambda i: (0, i)),  # feature-major out
        compiler_params=pltpu.CompilerParams(
            dimension_semantics=("parallel",),
            vmem_limit_bytes=32 * 1024 * 1024),
    )(x_in, w1t, b1t, w2t, b2t, w3t, b3t, w4t, b4t)

    y_t = out_t if B_pad == B else out_t[:, :B]
    return y_t.T                                      # (B, n_output)


def init_params(key, n_feature, n_hidden, n_output):
    """Deterministic synthetic parameters (shapes match the PyTorch module,
    with weights stored transposed: (in_features, out_features))."""
    ks = jax.random.split(key, 8)

    def lin(kw, kb, fan_in, fan_out):
        bound = 1.0 / jnp.sqrt(fan_in)
        w = jax.random.uniform(kw, (fan_in, fan_out), jnp.float32, -bound, bound)
        b = jax.random.uniform(kb, (1, fan_out), jnp.float32, -bound, bound)
        return w, b

    w1, b1 = lin(ks[0], ks[1], n_feature, n_hidden)
    w2, b2 = lin(ks[2], ks[3], n_hidden, n_hidden)
    w3, b3 = lin(ks[4], ks[5], n_hidden, n_output)
    w4, b4 = lin(ks[6], ks[7], n_output, n_output)
    return dict(w1=w1, b1=b1, w2=w2, b2=b2, w3=w3, b3=b3, w4=w4, b4=b4)


def _reference(x, p):
    def mish(v):
        return v * jnp.tanh(jax.nn.softplus(v))
    h = mish(x @ p["w1"] + p["b1"])
    h = mish(h @ p["w2"] + p["b2"])
    h = mish(h @ p["w3"] + p["b3"])
    return h @ p["w4"] + p["b4"]


if __name__ == "__main__":
    key = jax.random.PRNGKey(0)
    k_x, k_p = jax.random.split(key)

    batch, n_feature, n_hidden, n_output = 8, 16, 32, 8

    x = jax.random.normal(k_x, (batch, n_feature), jnp.float32)
    params = init_params(k_p, n_feature, n_hidden, n_output)

    out = net_mish_ranger_forward(x, params)
    out = jax.block_until_ready(out)

    ref = _reference(x, params)
    assert out.shape == (batch, n_output)
    assert jnp.allclose(out, ref, atol=1e-4, rtol=1e-4), "mismatch vs reference"

    print("KERNEL_OK")
</pallas_src>

<mosaic_0001>
module attributes {stable_mosaic.version = 11 : i64} {
  func.func @_net_kernel(%arg0: i32, %arg1: memref<8x16xf32, #tpu.memory_space<vmem>>, %arg2: memref<32x16xf32, #tpu.memory_space<vmem>>, %arg3: memref<32x1xf32, #tpu.memory_space<vmem>>, %arg4: memref<32x32xf32, #tpu.memory_space<vmem>>, %arg5: memref<32x1xf32, #tpu.memory_space<vmem>>, %arg6: memref<8x32xf32, #tpu.memory_space<vmem>>, %arg7: memref<8x1xf32, #tpu.memory_space<vmem>>, %arg8: memref<8x8xf32, #tpu.memory_space<vmem>>, %arg9: memref<8x1xf32, #tpu.memory_space<vmem>>, %arg10: memref<8x8xf32, #tpu.memory_space<vmem>>) attributes {dimension_semantics = [#tpu.dimension_semantics<parallel>], iteration_bounds = array<i64: 1>, scalar_prefetch = 0 : i64, scratch_operands = 0 : i64, tpu.core_type = #tpu.core_type<tc>, window_params = [{transform_indices = @transform_0, window_bounds = array<i64: 8, 16>}, {pipeline_mode = #tpu.pipeline_mode<synchronous>, transform_indices = @transform_1, window_bounds = array<i64: 32, 16>}, {pipeline_mode = #tpu.pipeline_mode<synchronous>, transform_indices = @transform_2, window_bounds = array<i64: 32, 1>}, {pipeline_mode = #tpu.pipeline_mode<synchronous>, transform_indices = @transform_3, window_bounds = array<i64: 32, 32>}, {pipeline_mode = #tpu.pipeline_mode<synchronous>, transform_indices = @transform_4, window_bounds = array<i64: 32, 1>}, {pipeline_mode = #tpu.pipeline_mode<synchronous>, transform_indices = @transform_5, window_bounds = array<i64: 8, 32>}, {pipeline_mode = #tpu.pipeline_mode<synchronous>, transform_indices = @transform_6, window_bounds = array<i64: 8, 1>}, {pipeline_mode = #tpu.pipeline_mode<synchronous>, transform_indices = @transform_7, window_bounds = array<i64: 8, 8>}, {pipeline_mode = #tpu.pipeline_mode<synchronous>, transform_indices = @transform_8, window_bounds = array<i64: 8, 1>}, {transform_indices = @transform_9, window_bounds = array<i64: 8, 8>}]} {
    %c0 = arith.constant 0 : index
    %c0_0 = arith.constant 0 : index
    %0 = vector.load %arg1[%c0, %c0_0] : memref<8x16xf32, #tpu.memory_space<vmem>>, vector<8x16xf32>
    %c0_1 = arith.constant 0 : index
    %c0_2 = arith.constant 0 : index
    %1 = vector.load %arg2[%c0_1, %c0_2] : memref<32x16xf32, #tpu.memory_space<vmem>>, vector<32x16xf32>
    %cst = arith.constant dense<0.000000e+00> : vector<32x8xf32>
    %2 = tpu.matmul %1, %0, %cst {dimension_numbers = #tpu.dot_dimension_numbers<[1], [1], [0], [0], [0, 0, 1, 0], [], []>} : vector<32x16xf32>, vector<8x16xf32>, vector<32x8xf32> -> vector<32x8xf32>
    %c0_3 = arith.constant 0 : index
    %c0_4 = arith.constant 0 : index
    %3 = vector.load %arg3[%c0_3, %c0_4] : memref<32x1xf32, #tpu.memory_space<vmem>>, vector<32x1xf32>
    %4 = vector.broadcast %3 : vector<32x1xf32> to vector<32x8xf32>
    %5 = arith.addf %2, %4 : vector<32x8xf32>
    %cst_5 = arith.constant 2.000000e+01 : f32
    %6 = vector.broadcast %cst_5 : f32 to vector<32x8xf32>
    %7 = arith.minimumf %5, %6 : vector<32x8xf32>
    %8 = math.exp %7 : vector<32x8xf32>
    %cst_6 = arith.constant 2.000000e+00 : f32
    %9 = vector.broadcast %cst_6 : f32 to vector<32x8xf32>
    %10 = arith.addf %8, %9 : vector<32x8xf32>
    %11 = arith.mulf %8, %10 : vector<32x8xf32>
    %cst_7 = arith.constant 2.000000e+00 : f32
    %12 = vector.broadcast %cst_7 : f32 to vector<32x8xf32>
    %13 = arith.addf %11, %12 : vector<32x8xf32>
    %14 = tpu.reciprocal %13 {approx = true} : vector<32x8xf32> -> vector<32x8xf32>
    %15 = arith.mulf %13, %14 : vector<32x8xf32>
    %cst_8 = arith.constant 2.000000e+00 : f32
    %16 = vector.broadcast %cst_8 : f32 to vector<32x8xf32>
    %17 = arith.subf %16, %15 : vector<32x8xf32>
    %18 = arith.mulf %14, %17 : vector<32x8xf32>
    %19 = arith.mulf %5, %11 : vector<32x8xf32>
    %20 = arith.mulf %19, %18 : vector<32x8xf32>
    %c0_9 = arith.constant 0 : index
    %c0_10 = arith.constant 0 : index
    %21 = vector.load %arg4[%c0_9, %c0_10] : memref<32x32xf32, #tpu.memory_space<vmem>>, vector<32x32xf32>
    %cst_11 = arith.constant dense<0.000000e+00> : vector<32x8xf32>
    %22 = tpu.matmul %21, %20, %cst_11 {dimension_numbers = #tpu.dot_dimension_numbers<[1], [0], [0], [1], [0, 0, 1, 1], [], []>} : vector<32x32xf32>, vector<32x8xf32>, vector<32x8xf32> -> vector<32x8xf32>
    %c0_12 = arith.constant 0 : index
    %c0_13 = arith.constant 0 : index
    %23 = vector.load %arg5[%c0_12, %c0_13] : memref<32x1xf32, #tpu.memory_space<vmem>>, vector<32x1xf32>
    %24 = vector.broadcast %23 : vector<32x1xf32> to vector<32x8xf32>
    %25 = arith.addf %22, %24 : vector<32x8xf32>
    %cst_14 = arith.constant 2.000000e+01 : f32
    %26 = vector.broadcast %cst_14 : f32 to vector<32x8xf32>
    %27 = arith.minimumf %25, %26 : vector<32x8xf32>
    %28 = math.exp %27 : vector<32x8xf32>
    %cst_15 = arith.constant 2.000000e+00 : f32
    %29 = vector.broadcast %cst_15 : f32 to vector<32x8xf32>
    %30 = arith.addf %28, %29 : vector<32x8xf32>
    %31 = arith.mulf %28, %30 : vector<32x8xf32>
    %cst_16 = arith.constant 2.000000e+00 : f32
    %32 = vector.broadcast %cst_16 : f32 to vector<32x8xf32>
    %33 = arith.addf %31, %32 : vector<32x8xf32>
    %34 = tpu.reciprocal %33 {approx = true} : vector<32x8xf32> -> vector<32x8xf32>
    %35 = arith.mulf %33, %34 : vector<32x8xf32>
    %cst_17 = arith.constant 2.000000e+00 : f32
    %36 = vector.broadcast %cst_17 : f32 to vector<32x8xf32>
    %37 = arith.subf %36, %35 : vector<32x8xf32>
    %38 = arith.mulf %34, %37 : vector<32x8xf32>
    %39 = arith.mulf %25, %31 : vector<32x8xf32>
    %40 = arith.mulf %39, %38 : vector<32x8xf32>
    %c0_18 = arith.constant 0 : index
    %c0_19 = arith.constant 0 : index
    %41 = vector.load %arg6[%c0_18, %c0_19] : memref<8x32xf32, #tpu.memory_space<vmem>>, vector<8x32xf32>
    %cst_20 = arith.constant dense<0.000000e+00> : vector<8x8xf32>
    %42 = tpu.matmul %41, %40, %cst_20 {dimension_numbers = #tpu.dot_dimension_numbers<[1], [0], [0], [1], [0, 0, 1, 1], [], []>} : vector<8x32xf32>, vector<32x8xf32>, vector<8x8xf32> -> vector<8x8xf32>
    %c0_21 = arith.constant 0 : index
    %c0_22 = arith.constant 0 : index
    %43 = vector.load %arg7[%c0_21, %c0_22] : memref<8x1xf32, #tpu.memory_space<vmem>>, vector<8x1xf32>
    %44 = vector.broadcast %43 : vector<8x1xf32> to vector<8x8xf32>
    %45 = arith.addf %42, %44 : vector<8x8xf32>
    %cst_23 = arith.constant 2.000000e+01 : f32
    %46 = vector.broadcast %cst_23 : f32 to vector<8x8xf32>
    %47 = arith.minimumf %45, %46 : vector<8x8xf32>
    %48 = math.exp %47 : vector<8x8xf32>
    %cst_24 = arith.constant 2.000000e+00 : f32
    %49 = vector.broadcast %cst_24 : f32 to vector<8x8xf32>
    %50 = arith.addf %48, %49 : vector<8x8xf32>
    %51 = arith.mulf %48, %50 : vector<8x8xf32>
    %cst_25 = arith.constant 2.000000e+00 : f32
    %52 = vector.broadcast %cst_25 : f32 to vector<8x8xf32>
    %53 = arith.addf %51, %52 : vector<8x8xf32>
    %54 = tpu.reciprocal %53 {approx = true} : vector<8x8xf32> -> vector<8x8xf32>
    %55 = arith.mulf %53, %54 : vector<8x8xf32>
    %cst_26 = arith.constant 2.000000e+00 : f32
    %56 = vector.broadcast %cst_26 : f32 to vector<8x8xf32>
    %57 = arith.subf %56, %55 : vector<8x8xf32>
    %58 = arith.mulf %54, %57 : vector<8x8xf32>
    %59 = arith.mulf %45, %51 : vector<8x8xf32>
    %60 = arith.mulf %59, %58 : vector<8x8xf32>
    %c0_27 = arith.constant 0 : index
    %c0_28 = arith.constant 0 : index
    %61 = vector.load %arg8[%c0_27, %c0_28] : memref<8x8xf32, #tpu.memory_space<vmem>>, vector<8x8xf32>
    %cst_29 = arith.constant dense<0.000000e+00> : vector<8x8xf32>
    %62 = tpu.matmul %61, %60, %cst_29 {dimension_numbers = #tpu.dot_dimension_numbers<[1], [0], [0], [1], [0, 0, 1, 1], [], []>} : vector<8x8xf32>, vector<8x8xf32>, vector<8x8xf32> -> vector<8x8xf32>
    %c0_30 = arith.constant 0 : index
    %c0_31 = arith.constant 0 : index
    %63 = vector.load %arg9[%c0_30, %c0_31] : memref<8x1xf32, #tpu.memory_space<vmem>>, vector<8x1xf32>
    %64 = vector.broadcast %63 : vector<8x1xf32> to vector<8x8xf32>
    %65 = arith.addf %62, %64 : vector<8x8xf32>
    %c0_32 = arith.constant 0 : index
    %c0_33 = arith.constant 0 : index
    %66 = vector.load %arg10[%c0_32, %c0_33] : memref<8x8xf32, #tpu.memory_space<vmem>>, vector<8x8xf32>
    tpu.vector_store %arg10[%c0_32, %c0_33], %65 {strides = array<i32>} : memref<8x8xf32, #tpu.memory_space<vmem>>, vector<8x8xf32>,
    return
  }
  func.func @transform_0(%arg0: i32) -> (i32, i32) {
    %c0_i32 = arith.constant 0 : i32
    %c0_i32_0 = arith.constant 0 : i32
    return %arg0, %c0_i32 : i32, i32
  }
  func.func @transform_1(%arg0: i32) -> (i32, i32) {
    %c0_i32 = arith.constant 0 : i32
    %c0_i32_0 = arith.constant 0 : i32
    %c0_i32_1 = arith.constant 0 : i32
    return %c0_i32, %c0_i32_0 : i32, i32
  }
  func.func @transform_2(%arg0: i32) -> (i32, i32) {
    %c0_i32 = arith.constant 0 : i32
    %c0_i32_0 = arith.constant 0 : i32
    %c0_i32_1 = arith.constant 0 : i32
    return %c0_i32, %c0_i32_0 : i32, i32
  }
  func.func @transform_3(%arg0: i32) -> (i32, i32) {
    %c0_i32 = arith.constant 0 : i32
    %c0_i32_0 = arith.constant 0 : i32
    %c0_i32_1 = arith.constant 0 : i32
    return %c0_i32, %c0_i32_0 : i32, i32
  }
  func.func @transform_4(%arg0: i32) -> (i32, i32) {
    %c0_i32 = arith.constant 0 : i32
    %c0_i32_0 = arith.constant 0 : i32
    %c0_i32_1 = arith.constant 0 : i32
    return %c0_i32, %c0_i32_0 : i32, i32
  }
  func.func @transform_5(%arg0: i32) -> (i32, i32) {
    %c0_i32 = arith.constant 0 : i32
    %c0_i32_0 = arith.constant 0 : i32
    %c0_i32_1 = arith.constant 0 : i32
    return %c0_i32, %c0_i32_0 : i32, i32
  }
  func.func @transform_6(%arg0: i32) -> (i32, i32) {
    %c0_i32 = arith.constant 0 : i32
    %c0_i32_0 = arith.constant 0 : i32
    %c0_i32_1 = arith.constant 0 : i32
    return %c0_i32, %c0_i32_0 : i32, i32
  }
  func.func @transform_7(%arg0: i32) -> (i32, i32) {
    %c0_i32 = arith.constant 0 : i32
    %c0_i32_0 = arith.constant 0 : i32
    %c0_i32_1 = arith.constant 0 : i32
    return %c0_i32, %c0_i32_0 : i32, i32
  }
  func.func @transform_8(%arg0: i32) -> (i32, i32) {
    %c0_i32 = arith.constant 0 : i32
    %c0_i32_0 = arith.constant 0 : i32
    %c0_i32_1 = arith.constant 0 : i32
    return %c0_i32, %c0_i32_0 : i32, i32
  }
  func.func @transform_9(%arg0: i32) -> (i32, i32) {
    %c0_i32 = arith.constant 0 : i32
    %c0_i32_0 = arith.constant 0 : i32
    return %c0_i32, %arg0 : i32, i32
  }
}

</mosaic_0001>

<bundles_post_ra>
// kernel: tpu_custom_call.1
= control target key start
LH: loop header
LB: loop body
LE: loop exit
PB: predicated region body
PF: predicated region fallthrough
CT: control target
= control target key end

     0   :  { %vm62_vm0 = vcmask 130048   ;;  %v723_v4 = vmov 0   ;;  %s871_s0 = inlined_call_operand.vmem [shape: f32[8,16], index: 0, kind: input, shape index: {}]   ;;  %s872_s1 = inlined_call_operand.vmem [shape: f32[32,16], index: 1, kind: input, shape index: {}]   ;;  %s873_s2 = inlined_call_operand.vmem [shape: f32[32,1], index: 2, kind: input, shape index: {}]   ;;  %s874_s3 = inlined_call_operand.vmem [shape: f32[32,32], index: 3, kind: input, shape index: {}]   ;;  %s875_s4 = inlined_call_operand.vmem [shape: f32[32,1], index: 4, kind: input, shape index: {}]   ;;  %s876_s5 = inlined_call_operand.vmem [shape: f32[8,32], index: 5, kind: input, shape index: {}]   ;;  %s877_s6 = inlined_call_operand.vmem [shape: f32[8,1], index: 6, kind: input, shape index: {}]   ;;  %s878_s7 = inlined_call_operand.vmem [shape: f32[8,8], index: 7, kind: input, shape index: {}]   ;;  %s879_s8 = inlined_call_operand.vmem [shape: f32[8,1], index: 8, kind: input, shape index: {}]   ;;  %s880_s9 = inlined_call_operand.hbm [shape: f32[8,8], index: 9, kind: output, shape index: {}]  }
   0x1   :  { %v33_v0 = vld [vmem:[%s871_s0] sm:$0xff]  ;;  %v35_v3 = vld [vmem:[%s872_s1 + $0x8] sm:$0xff]  ;;  %661 = vset.pattern.permute.xlu0 %v723_v4  ;;  %v40_v5 = vld [vmem:[%s873_s2 + $0x10] sm:$0xff]  ;;  %662 = vset.pattern.permute.xlu1 %v723_v4 }
   0x2   :  { %v34_v1 = vld [vmem:[%s872_s1] sm:$0xff]  ;;  %604 = vmatprep.subr.msk.mxu0 %vm62_vm0, %v33_v0  ;;  %v36_v6 = vld [vmem:[%s872_s1 + $0x10] sm:$0xff]  ;;  %54 = vperm.xlu1 %662, %v40_v5   ;;  %v39_v7 = vld [vmem:[%s873_s2 + $0x8] sm:$0xff] }
   0x3   :  { %606 = vmatprep.mubr.msk.f32.mxu0 %vm62_vm0, %v34_v1  ;;  %v38_v2 = vld [vmem:[%s873_s2] sm:$0xff]  ;;  %605 = vmatpush3.xpose.msk.msra.mxu0 %vm62_vm0, %v33_v0  ;;  %v41_v8 = vld [vmem:[%s873_s2 + $0x18] sm:$0xff] }
   0x4   :  { %44 = vperm.xlu0 %661, %v38_v2  }
   0x6   :  { %607 = vmatmul.mubr.msk.f32.vlgmr.msra.gmra.mrb[0].mxu0 %vm62_vm0, %v35_v3 }
   0x7   :  { %14 = vsyncpa [#allocation3], 0  ;;  %609 = vmatprep.mubr.msk.f32.mxu0 %vm62_vm0, %v36_v6  ;;  %v37_v9 = vld [vmem:[%s872_s1 + $0x18] sm:$0xff]  ;;  %59 = vperm.xlu1 %662, %v41_v8   ;;  %v215_v10 = vld [vmem:[%s875_s4] sm:$0xff]  ;;  %vm239_vm1 = vcmask 261120   ;;  %vm725_vm2 = vmmov 0  }
   0x8   :  { %49 = vperm.xlu0 %661, %v39_v7   ;;  %v216_v11 = vld [vmem:[%s875_s4 + $0x8] sm:$0xff]  ;;  %v217_v12 = vld [vmem:[%s875_s4 + $0x10] sm:$0xff]  ;;  %v218_v13 = vld [vmem:[%s875_s4 + $0x18] sm:$0xff]  ;;  %vm484_vm3 = vcmask 64512   ;;  %s727_s21 = smov [#allocation2]  }
   0x9   :  { %v386_v14 = vld [vmem:[%s877_s6] sm:$0xff]  ;;  %s565_s22 = sshll.u32 %s727_s21, 4  ;;  %s566_s22 = int_to_ptr.vmem [resolvable:$true] %s565_s22 }
   0xa   :  { %610 = vmatmul.mubr.msk.f32.gmra.mrb[2].mxu0 %vm62_vm0, %v37_v9  ;;  %v478_v15 = vld [vmem:[%s879_s8] sm:$0xff]  ;;  %s699_s23 = scalar_lea.vmem %s566_s22, 128  ;;  %p704_p1 = scmp.lt.s32.totalorder %s566_s22, %s566_s22 }
   0xb   :  { %226 = vperm.xlu1 %662, %v216_v11   ;;  %v211_v16 = vld [vmem:[%s874_s3] sm:$0xff]  ;;  %p700_p0 = scmp.ne.s32.totalorder %s566_s22, %s699_s23  ;;  %p705_p2 = scmp.lt.s32.totalorder %s699_s23, %s699_s23 }
   0xc   :  { %221 = vperm.xlu0 %661, %v215_v10   ;;  %620 = vmatprep.mubr.msk.f32.mxu1 %vm239_vm1, %v211_v16  ;;  %v213_v16 = vld [vmem:[%s874_s3 + $0x10] sm:$0xff] }
   0xd   :  { %p706_p3 = por %p705_p2, %p704_p1 }
   0xf   :  { %236 = vperm.xlu1 %662, %v218_v13   ;;  %p707_p4 = pnand %p706_p3, %p700_p0 }
  0x10   :  { %231 = vperm.xlu0 %661, %v217_v12  }
  0x13   :  { %481 = vperm.xlu1 %662, %v478_v15   ;;  %v212_v15 = vld [vmem:[%s874_s3 + $0x8] sm:$0xff] }
  0x14   :  { %389 = vperm.xlu0 %661, %v386_v14  }
  0x81   :  { %v55_v18 = vpop.permute.xlu1 %54 }
  0x83   :  { %v45_v17 = vpop.permute.xlu0 %44 }
  0x86   :  { %v60_v25 = vpop.permute.xlu1 %59 }
  0x87   :  { %v50_v19 = vpop.permute.xlu0 %49 }
  0xd9   :  { %v608_v20 = vpop.f32.mrb[0].mxu0 }
  0xda   :  { %v150_v21 = vadd.f32 %v608_v20, %v50_v19  ;;  %v144_v22 = vpop.f32.mrb[1].mxu0  ;;  %v726_v19 = vmov 0.0   ;;  %v227_v20 = vpop.permute.xlu1 %226 }
  0xdb   :  { %v145_v23 = vadd.f32 %v144_v22, %v45_v17  ;;  %v214_v17 = vld [vmem:[%s874_s3 + $0x18] sm:$0xff]  ;;  %634 = vmatprep.mubr.msk.f32.mxu0 %vm725_vm2, %v726_v19 }
  0xdc   :  { %v164_v24 = vmin.f32 %v150_v21, 20.0 }
  0xdd   :  { %v163_v26 = vmin.f32 %v145_v23, 20.0  ;;  %v611_v27 = vpop.f32.mrb[2].mxu0 }
  0xde   :  { %v169_v28 = vmul.f32 1.442695, %v164_v24  ;;  %v160_v29 = vadd.f32 %v611_v27, %v60_v25  ;;  %v154_v30 = vpop.f32.mrb[3].mxu0  ;;  %v237_v27 = vpop.permute.xlu1 %236 }
  0xdf   :  { %v167_v31 = vmul.f32 1.442695, %v163_v26  ;;  %v155_v32 = vadd.f32 %v154_v30, %v55_v18  ;;  %v724_v18 = vmov 0.0|0.0  }
  0xe0   :  { %663 = vpow2.f32 %v169_v28  ;;  %v166_v33 = vmin.f32 %v160_v29, 20.0  ;;  %650 = vmatprep.subr.bf16.mxu0 %v724_v18 }
  0xe1   :  { %665 = vpow2.f32 %v167_v31  ;;  %v165_v34 = vmin.f32 %v155_v32, 20.0 }
  0xe2   :  { %v173_v35 = vmul.f32 1.442695, %v166_v33 }
  0xe3   :  { %v171_v36 = vmul.f32 1.442695, %v165_v34 }
  0xe4   :  { %667 = vpow2.f32 %v173_v35 }
  0xe5   :  { %669 = vpow2.f32 %v171_v36 }
  0xea   :  { %v664_v37 = vpop.eup %663 }
  0xeb   :  { %v666_v38 = vpop.eup %665  ;;  %v176_v39 = vadd.f32 2.0, %v664_v37 }
  0xec   :  { %v175_v40 = vadd.f32 2.0, %v666_v38 }
  0xed   :  { %v180_v41 = vmul.f32 %v664_v37, %v176_v39 }
  0xee   :  { %v668_v42 = vpop.eup %667  ;;  %v179_v43 = vmul.f32 %v666_v38, %v175_v40 }
  0xef   :  { %v670_v44 = vpop.eup %669  ;;  %v184_v45 = vadd.f32 2.0, %v180_v41  ;;  %v178_v46 = vadd.f32 2.0, %v668_v42  ;;  %v204_v61 = vmul.f32 %v180_v41, %v150_v21  ;;  %v222_v21 = vpop.permute.xlu0 %221 }
  0xf0   :  { %v183_v47 = vadd.f32 2.0, %v179_v43  ;;  %v177_v48 = vadd.f32 2.0, %v670_v44  ;;  %v203_v0 = vmul.f32 %v179_v43, %v145_v23 }
  0xf1   :  { %671 = vrcp.f32 %v184_v45  ;;  %v182_v49 = vmul.f32 %v668_v42, %v178_v46 }
  0xf2   :  { %673 = vrcp.f32 %v183_v47  ;;  %v181_v50 = vmul.f32 %v670_v44, %v177_v48 }
  0xf3   :  { %v186_v51 = vadd.f32 2.0, %v182_v49  ;;  %v206_v8 = vmul.f32 %v182_v49, %v160_v29  ;;  %v232_v30 = vpop.permute.xlu0 %231 }
  0xf4   :  { %v185_v52 = vadd.f32 2.0, %v181_v50  ;;  %v205_v10 = vmul.f32 %v181_v50, %v155_v32 }
  0xf5   :  { %675 = vrcp.f32 %v186_v51 }
  0xf6   :  { %677 = vrcp.f32 %v185_v52 }
  0xfb   :  { %v672_v53 = vpop.eup %671 }
  0xfc   :  { %v674_v54 = vpop.eup %673  ;;  %v192_v55 = vmul.f32 %v672_v53, %v184_v45 }
  0xfd   :  { %v191_v56 = vmul.f32 %v674_v54, %v183_v47 }
  0xfe   :  { %v196_v57 = vsub.f32 2.0, %v192_v55 }
  0xff   :  { %v676_v58 = vpop.eup %675  ;;  %v195_v59 = vsub.f32 2.0, %v191_v56 }
 0x100   :  { %v678_v60 = vpop.eup %677  ;;  %v194_v62 = vmul.f32 %v676_v58, %v186_v51  ;;  %v200_v63 = vmul.f32 %v672_v53, %v196_v57 }
 0x101   :  { %v193_v1 = vmul.f32 %v678_v60, %v185_v52  ;;  %v199_v2 = vmul.f32 %v674_v54, %v195_v59 }
 0x102   :  { %v198_v3 = vsub.f32 2.0, %v194_v62  ;;  %v208_v4 = vmul.f32 %v204_v61, %v200_v63 }
 0x103   :  { %v197_v5 = vsub.f32 2.0, %v193_v1  ;;  %v207_v6 = vmul.f32 %v203_v0, %v199_v2 }
 0x104   :  { %v202_v7 = vmul.f32 %v676_v58, %v198_v3 }
 0x105   :  { %v201_v9 = vmul.f32 %v678_v60, %v197_v5  ;;  %v642_v11 = vpack.c.bf16 %v208_v4, %v207_v6 }
 0x106   :  { %v210_v12 = vmul.f32 %v206_v8, %v202_v7 }
 0x107   :  { %v209_v13 = vmul.f32 %v205_v10, %v201_v9  ;;  %643 = vmatprep.subr.bf16.mxu1 %v642_v11 }
 0x108   :  { %645 = vmatpush3.bf16.msra.mxu1 %v642_v11 }
 0x109   :  { %v646_v14 = vpack.c.bf16 %v210_v12, %v209_v13 }
 0x10b   :  { %647 = vmatprep.subr.bf16.mxu1 %v646_v14 }
 0x10c   :  { %649 = vmatpush3.bf16.msra.mxu1 %v646_v14 }
 0x10f   :  { %621 = vmatmul.mubr.msk.f32.vlgmr.msra.gmra.mrb[0].mxu1 %vm239_vm1, %v212_v15 }
 0x110   :  { %623 = vmatprep.mubr.msk.f32.mxu1 %vm239_vm1, %v213_v16 }
 0x113   :  { %624 = vmatmul.mubr.msk.f32.gmra.mrb[2].mxu1 %vm239_vm1, %v214_v17 }
 0x1e2   :  { %v622_v22 = vpop.f32.mrb[0].mxu1 }
 0x1e3   :  { %v324_v23 = vadd.f32 %v622_v22, %v227_v20  ;;  %v318_v24 = vpop.f32.mrb[1].mxu1  ;;  %v385_v20 = vld [vmem:[%s876_s5] sm:$0xff] }
 0x1e4   :  { %v319_v25 = vadd.f32 %v318_v24, %v222_v21  ;;  %v390_v21 = vpop.permute.xlu0 %389 }
 0x1e5   :  { %v338_v26 = vmin.f32 %v324_v23, 20.0 }
 0x1e6   :  { %v337_v28 = vmin.f32 %v319_v25, 20.0  ;;  %v625_v29 = vpop.f32.mrb[2].mxu1 }
 0x1e7   :  { %v343_v31 = vmul.f32 1.442695, %v338_v26  ;;  %v334_v32 = vadd.f32 %v625_v29, %v237_v27  ;;  %v328_v33 = vpop.f32.mrb[3].mxu1 }
 0x1e8   :  { %v341_v34 = vmul.f32 1.442695, %v337_v28  ;;  %v329_v35 = vadd.f32 %v328_v33, %v232_v30 }
 0x1e9   :  { %679 = vpow2.f32 %v343_v31  ;;  %v340_v36 = vmin.f32 %v334_v32, 20.0 }
 0x1ea   :  { %681 = vpow2.f32 %v341_v34  ;;  %v339_v37 = vmin.f32 %v329_v35, 20.0 }
 0x1eb   :  { %v347_v38 = vmul.f32 1.442695, %v340_v36  ;;  %v482_v36 = vpop.permute.xlu1 %481 }
 0x1ec   :  { %v345_v39 = vmul.f32 1.442695, %v339_v37 }
 0x1ed   :  { %683 = vpow2.f32 %v347_v38 }
 0x1ee   :  { %685 = vpow2.f32 %v345_v39 }
 0x1f3   :  { %v680_v40 = vpop.eup %679 }
 0x1f4   :  { %v682_v41 = vpop.eup %681  ;;  %v350_v42 = vadd.f32 2.0, %v680_v40 }
 0x1f5   :  { %v349_v43 = vadd.f32 2.0, %v682_v41 }
 0x1f6   :  { %v354_v44 = vmul.f32 %v680_v40, %v350_v42 }
 0x1f7   :  { %v684_v45 = vpop.eup %683  ;;  %v353_v46 = vmul.f32 %v682_v41, %v349_v43 }
 0x1f8   :  { %v686_v47 = vpop.eup %685  ;;  %v358_v48 = vadd.f32 2.0, %v354_v44  ;;  %v352_v49 = vadd.f32 2.0, %v684_v45  ;;  %v378_v1 = vmul.f32 %v354_v44, %v324_v23 }
 0x1f9   :  { %v357_v50 = vadd.f32 2.0, %v353_v46  ;;  %v351_v51 = vadd.f32 2.0, %v686_v47  ;;  %v377_v4 = vmul.f32 %v353_v46, %v319_v25 }
 0x1fa   :  { %687 = vrcp.f32 %v358_v48  ;;  %v356_v52 = vmul.f32 %v684_v45, %v352_v49 }
 0x1fb   :  { %689 = vrcp.f32 %v357_v50  ;;  %v355_v53 = vmul.f32 %v686_v47, %v351_v51 }
 0x1fc   :  { %v360_v54 = vadd.f32 2.0, %v356_v52  ;;  %v380_v11 = vmul.f32 %v356_v52, %v334_v32 }
 0x1fd   :  { %v359_v55 = vadd.f32 2.0, %v355_v53  ;;  %v379_v14 = vmul.f32 %v355_v53, %v329_v35 }
 0x1fe   :  { %691 = vrcp.f32 %v360_v54 }
 0x1ff   :  { %693 = vrcp.f32 %v359_v55 }
 0x204   :  { %v688_v56 = vpop.eup %687 }
 0x205   :  { %v690_v57 = vpop.eup %689  ;;  %v366_v58 = vmul.f32 %v688_v56, %v358_v48 }
 0x206   :  { %v365_v59 = vmul.f32 %v690_v57, %v357_v50 }
 0x207   :  { %v370_v60 = vsub.f32 2.0, %v366_v58 }
 0x208   :  { %v692_v61 = vpop.eup %691  ;;  %v369_v62 = vsub.f32 2.0, %v365_v59 }
 0x209   :  { %v694_v63 = vpop.eup %693  ;;  %v374_v0 = vmul.f32 %v688_v56, %v370_v60  ;;  %v368_v2 = vmul.f32 %v692_v61, %v360_v54 }
 0x20a   :  { %v373_v3 = vmul.f32 %v690_v57, %v369_v62  ;;  %v367_v5 = vmul.f32 %v694_v63, %v359_v55 }
 0x20b   :  { %v382_v6 = vmul.f32 %v378_v1, %v374_v0  ;;  %v372_v7 = vsub.f32 2.0, %v368_v2 }
 0x20c   :  { %v381_v8 = vmul.f32 %v377_v4, %v373_v3  ;;  %v371_v9 = vsub.f32 2.0, %v367_v5 }
 0x20d   :  { %v376_v10 = vmul.f32 %v692_v61, %v372_v7 }
 0x20e   :  { %v651_v12 = vpack.c.bf16 %v382_v6, %v381_v8  ;;  %v375_v13 = vmul.f32 %v694_v63, %v371_v9 }
 0x20f   :  { %v384_v15 = vmul.f32 %v380_v11, %v376_v10 }
 0x210   :  { %v383_v16 = vmul.f32 %v379_v14, %v375_v13  ;;  %652 = vmatpush3.bf16.msra.mxu0 %v651_v12 }
 0x211   :  { %653 = vmatprep.subr.bf16.mxu0 %v724_v18 }
 0x212   :  { %v654_v17 = vpack.c.bf16 %v384_v15, %v383_v16 }
 0x214   :  { %655 = vmatpush3.bf16.msra.mxu0 %v654_v17 }
 0x215   :  { %637 = vmatprep.subr.mxu0 %v726_v19 }
 0x217   :  { %635 = vmatmul.mubr.msk.f32.vlgmr.msra.gmra.mrb[4].mxu0 %vm239_vm1, %v385_v20 }
 0x218   :  { %639 = vmatprep.mubr.msk.f32.mxu0 %vm725_vm2, %v726_v19  ;;  %v477_v19 = vld [vmem:[%s878_s7] sm:$0xff] }
 0x2ea   :  { %v461_v22 = vpop.f32.mrb[4].mxu0 }
 0x2eb   :  { %v462_v23 = vadd.f32 %v461_v22, %v390_v21  ;;  %v636_v24 = vpop.f32.mrb[5].mxu0 }
 0x2ed   :  { %v465_v25 = vmin.f32 %v462_v23, 20.0 }
 0x2ef   :  { %v466_v26 = vmul.f32 1.442695, %v465_v25 }
 0x2f1   :  { %695 = vpow2.f32 %v466_v26 }
 0x2fb   :  { %v696_v18 = vpop.eup %695 }
 0x2fc   :  { %v468_v27 = vadd.f32 2.0, %v696_v18 }
 0x2fe   :  { %v469_v28 = vmul.f32 %v696_v18, %v468_v27 }
 0x300   :  { %v470_v29 = vadd.f32 2.0, %v469_v28  ;;  %v475_v34 = vmul.f32 %v469_v28, %v462_v23 }
 0x302   :  { %697 = vrcp.f32 %v470_v29 }
 0x30c   :  { %v698_v30 = vpop.eup %697 }
 0x30d   :  { %v472_v31 = vmul.f32 %v698_v30, %v470_v29 }
 0x30f   :  { %v473_v32 = vsub.f32 2.0, %v472_v31 }
 0x311   :  { %v474_v33 = vmul.f32 %v698_v30, %v473_v32 }
 0x313   :  { %v476_v35 = vmul.f32 %v475_v34, %v474_v33 }
 0x315   :  { %638 = vmatpush3.msra.mxu0 %v476_v35 }
 0x316   :  { %640 = vmatmul.mubr.msk.f32.vlgmr.msra.gmra.mrb[6].mxu0 %vm484_vm3, %v477_v19 }
 0x3e9   :  { %v554_v37 = vpop.f32.mrb[6].mxu0 }
 0x3ea   :  { %v555_v38 = vadd.f32 %v554_v37, %v482_v36  ;;  %v641_v39 = vpop.f32.mrb[7].mxu0 }
 0x3ec   :  { %558 = vst.msk [vmem:[#allocation2] sm:$0xff] %vm484_vm3, %v555_v38 }
 0x3ed   :  { %710 = shalt.err (!%p707_p4)
}
 0x3ee   :  { %s711_s25 = scalar_lea.hbm %s880_s9, 128 }
 0x3ef   :  { %p712_p5 = scmp.ne.s32.totalorder %s880_s9, %s711_s25  ;;  %p715_p6 = scmp.lt.u32.totalorder %s711_s25, %s880_s9 }
 0x3f1   :  { %p717_p7 = pnand %p715_p6, %p712_p5 }
 0x3f3   :  { %720 = shalt.err (!%p717_p7)
}
 0x3f4   :  { %568 = dma.vmem_to_hbm [thread:$0]  %s566_s22, 128, %s880_s9, [#allocation3]  }
 0x3f5   :  { %721 = dma.done.wait [#allocation3], 128  }
 0x3f6   :  { %722 = vsyncadd [#allocation3], 4294967168 }
 0x3f7   :  { %572 = vsyncpa [#allocation3], 1 }

</bundles_post_ra>
